<compile_context>
chip_gen: v7x
topology: tpu7x:2x2x1
jax: 0.10.0
libtpu: 0.0.40
codegen_flags: <defaults>
</compile_context>

<pallas_src>
import functools

import jax
import jax.numpy as jnp
from jax.experimental import pallas as pl
from jax.experimental.pallas import tpu as pltpu


def _round_up(x: int, m: int) -> int:
    return ((x + m - 1) // m) * m


def _sublane_pack(dtype) -> int:
    # vreg sublane packing for this dtype: f32 -> 8, bf16 -> 16, int8/fp8 -> 32.
    return {4: 8, 2: 16, 1: 32}.get(jnp.dtype(dtype).itemsize, 8)


def _vmem_budget_bytes() -> int:
    """Generation-aware scoped-VMEM budget (leave headroom for compiler scratch)."""
    try:
        cap = int(pltpu.get_tpu_info().vmem_capacity_bytes)
    except Exception:
        cap = 128 << 20
    if cap <= (64 << 20):
        # v7x: 64 MiB physical per TensorCore -> stay well below it.
        return 44 << 20
    # v5e / v6e: 128 MiB physical.
    return 96 << 20


def _pad2d(a, rows, cols):
    r, c = a.shape
    if r == rows and c == cols:
        return a
    return jnp.pad(a, ((0, rows - r), (0, cols - c)))


# ----------------------------------------------------------------------------
# Kernels
# ----------------------------------------------------------------------------

def _resident_kernel(x_ref, wt_ref, b_ref, o_ref):
    # x_ref: [tm, Kp], wt_ref: [Kp, Np] (pre-transposed in wrapper), b_ref: [1, Np].
    # Single full-K matmul per grid step: no accumulator, no init/finalize;
    # wt/bias block indices are constant so they are DMAed into VMEM once.
    acc = jnp.dot(x_ref[...], wt_ref[...], preferred_element_type=jnp.float32)
    o_ref[...] = (acc + b_ref[...].astype(jnp.float32)).astype(o_ref.dtype)


def _tiled_kernel(x_ref, wt_ref, b_ref, o_ref, acc_ref):
    # Fallback: x_ref [tm, tk], wt_ref [tk, tn] (already transposed), b_ref [1, tn].
    k = pl.program_id(2)

    @pl.when(k == 0)
    def _():
        acc_ref[...] = jnp.zeros_like(acc_ref)

    acc_ref[...] += jnp.dot(
        x_ref[...], wt_ref[...], preferred_element_type=jnp.float32
    )

    @pl.when(k == pl.num_programs(2) - 1)
    def _():
        o_ref[...] = (acc_ref[...] + b_ref[...].astype(jnp.float32)).astype(
            o_ref.dtype
        )


# ----------------------------------------------------------------------------
# Wrapper
# ----------------------------------------------------------------------------

@functools.partial(
    jax.jit, static_argnames=("tm", "force_tiled", "cast_to_bf16")
)
def classifier_forward(x, weight, bias, *, tm=512, force_tiled=False,
                       cast_to_bf16=False):
    """Pallas equivalent of ClassifierNet.forward.

    x:      [B, num_in_channel]
    weight: [num_labels, num_in_channel]   (PyTorch nn.Linear layout)
    bias:   [num_labels]
    returns (out, x) with out: [B, num_labels]
    """
    B, K = x.shape
    N, Kw = weight.shape
    assert Kw == K, "weight feature dim must match x"

    out_dtype = x.dtype
    mm_dtype = jnp.bfloat16 if cast_to_bf16 else x.dtype
    itemsize = jnp.dtype(mm_dtype).itemsize
    out_itemsize = jnp.dtype(out_dtype).itemsize
    b_itemsize = jnp.dtype(bias.dtype).itemsize
    m_pack = _sublane_pack(mm_dtype)

    Np = _round_up(N, 128)
    Kp = _round_up(K, 128)
    budget = _vmem_budget_bytes()

    # ---- choose M tile -----------------------------------------------------
    tm_req = _round_up(min(tm, _round_up(B, m_pack)), m_pack)
    Bp0 = _round_up(B, m_pack)
    # v7x has 2 TensorCores and M is the only "parallel" axis in the resident
    # path: if batch allows, make at least 2 M tiles so both cores get work.
    if Bp0 // tm_req < 2 and Bp0 >= 2 * m_pack:
        tm_req = _round_up((Bp0 + 1) // 2, m_pack)

    def _resident_bytes(t):
        # double-buffered x + out tiles, double-buffered (constant-index) W + bias
        return (itemsize * (2 * t * Kp + 2 * Kp * Np + 2 * Np)
                + out_itemsize * 2 * t * Np)

    tm_r = tm_req
    while tm_r > m_pack and _resident_bytes(tm_r) > budget:
        tm_r = max(m_pack, _round_up(tm_r // 2, m_pack))

    use_resident = (not force_tiled) and _resident_bytes(tm_r) <= budget

    if use_resident:
        # -------------------- resident-weight fast path ----------------------
        tm_sel = tm_r
        Bp = _round_up(B, tm_sel)

        xp = _pad2d(x.astype(mm_dtype), Bp, Kp)
        wtp = _pad2d(weight.T.astype(mm_dtype), Kp, Np)   # one-time transpose
        bp = _pad2d(bias.reshape(1, N), 1, Np)

        footprint = _resident_bytes(tm_sel)
        vmem_limit = int(min(budget, max(2 * footprint, 32 << 20)))

        cost = pl.CostEstimate(
            flops=2 * B * K * N,
            transcendentals=0,
            bytes_accessed=((B * K + K * N) * itemsize
                            + N * b_itemsize
                            + B * N * out_itemsize),
        )

        out_padded = pl.pallas_call(
            _resident_kernel,
            out_shape=jax.ShapeDtypeStruct((Bp, Np), out_dtype),
            grid_spec=pltpu.PrefetchScalarGridSpec(
                num_scalar_prefetch=0,
                grid=(Bp // tm_sel,),
                in_specs=[
                    pl.BlockSpec((tm_sel, Kp), lambda i: (i, 0)),  # x tile
                    pl.BlockSpec((Kp, Np), lambda i: (0, 0)),      # W resident
                    pl.BlockSpec((1, Np), lambda i: (0, 0)),       # bias resident
                ],
                out_specs=pl.BlockSpec((tm_sel, Np), lambda i: (i, 0)),
            ),
            compiler_params=pltpu.CompilerParams(
                dimension_semantics=("parallel",),
                vmem_limit_bytes=vmem_limit,
            ),
            cost_estimate=cost,
        )(xp, wtp, bp)
    else:
        # -------------------- K/N-tiled fallback ------------------------------
        tn = min(256, Np)
        tk = min(512, Kp)
        Np_t = _round_up(N, tn)
        Kp_t = _round_up(K, tk)
        tm_sel = min(tm_req, 256)
        Bp = _round_up(B, tm_sel)

        xp = _pad2d(x.astype(mm_dtype), Bp, Kp_t)
        wtp = _pad2d(weight.T.astype(mm_dtype), Kp_t, Np_t)
        bp = _pad2d(bias.reshape(1, N), 1, Np_t)

        grid = (Bp // tm_sel, Np_t // tn, Kp_t // tk)
        grid_m, grid_n = grid[0], grid[1]

        tile_bytes = (itemsize * 2 * (tm_sel * tk + tk * tn + tn)
                      + out_itemsize * 2 * tm_sel * tn
                      + 4 * tm_sel * tn)
        vmem_limit = int(min(budget, max(2 * tile_bytes, 32 << 20)))

        cost = pl.CostEstimate(
            flops=2 * B * K * N,
            transcendentals=0,
            bytes_accessed=(grid_n * B * K * itemsize       # x re-read per N tile
                            + grid_m * K * N * itemsize     # W re-read per M tile
                            + N * b_itemsize
                            + B * N * out_itemsize),
        )

        out_padded = pl.pallas_call(
            _tiled_kernel,
            out_shape=jax.ShapeDtypeStruct((Bp, Np_t), out_dtype),
            grid_spec=pltpu.PrefetchScalarGridSpec(
                num_scalar_prefetch=0,
                grid=grid,
                in_specs=[
                    pl.BlockSpec((tm_sel, tk), lambda i, j, k: (i, k)),  # x
                    pl.BlockSpec((tk, tn), lambda i, j, k: (k, j)),      # W^T
                    pl.BlockSpec((1, tn), lambda i, j, k: (0, j)),       # bias
                ],
                out_specs=pl.BlockSpec((tm_sel, tn), lambda i, j, k: (i, j)),
                scratch_shapes=[pltpu.VMEM((tm_sel, tn), jnp.float32)],
            ),
            compiler_params=pltpu.CompilerParams(
                dimension_semantics=("parallel", "parallel", "arbitrary"),
                vmem_limit_bytes=vmem_limit,
            ),
            cost_estimate=cost,
        )(xp, wtp, bp)

    out = out_padded[:B, :N]
    return out, x


def init_params(key, num_in_channel, num_labels, dtype=jnp.float32):
    """Deterministic synthetic params matching nn.Linear(num_in_channel, num_labels)."""
    kw, kb = jax.random.split(key)
    bound = 1.0 / jnp.sqrt(jnp.asarray(num_in_channel, dtype))
    weight = jax.random.uniform(
        kw, (num_labels, num_in_channel), dtype, minval=-bound, maxval=bound
    )
    bias = jax.random.uniform(
        kb, (num_labels,), dtype, minval=-bound, maxval=bound
    )
    return weight, bias


if __name__ == "__main__":
    key = jax.random.PRNGKey(0)
    k_x, k_p, k_x2, k_p2 = jax.random.split(key, 4)

    # --- small classifier head: exercises the resident-weight fast path -----
    batch, num_in_channel, num_labels = 8, 32, 16
    x = jax.random.normal(k_x, (batch, num_in_channel), dtype=jnp.float32)
    weight, bias = init_params(k_p, num_in_channel, num_labels)

    out, x_pass = classifier_forward(x, weight, bias)
    jax.block_until_ready((out, x_pass))

    ref = x @ weight.T + bias
    assert out.shape == (batch, num_labels)
    assert x_pass.shape == x.shape
    assert jnp.allclose(out, ref, atol=1e-5, rtol=1e-5)
    assert jnp.array_equal(x_pass, x)

    # --- also exercise the K/N-tiled fallback path ---------------------------
    b2, k2, n2 = 64, 256, 128
    x2 = jax.random.normal(k_x2, (b2, k2), dtype=jnp.float32)
    w2, bi2 = init_params(k_p2, k2, n2)
    out2, _ = classifier_forward(x2, w2, bi2, force_tiled=True)
    jax.block_until_ready(out2)
    ref2 = x2 @ w2.T + bi2
    assert jnp.allclose(out2, ref2, atol=1e-4, rtol=1e-5)

    print("KERNEL_OK")
</pallas_src>

<mosaic_0001>
module attributes {stable_mosaic.version = 11 : i64} {
  func.func @_resident_kernel(%arg0: i32, %arg1: memref<8x128xf32, #tpu.memory_space<vmem>>, %arg2: memref<128x128xf32, #tpu.memory_space<vmem>>, %arg3: memref<1x128xf32, #tpu.memory_space<vmem>>, %arg4: memref<8x128xf32, #tpu.memory_space<vmem>>) attributes {dimension_semantics = [#tpu.dimension_semantics<parallel>], iteration_bounds = array<i64: 1>, scalar_prefetch = 0 : i64, scratch_operands = 0 : i64, tpu.core_type = #tpu.core_type<tc>, window_params = [{transform_indices = @transform_0, window_bounds = array<i64: 8, 128>}, {pipeline_mode = #tpu.pipeline_mode<synchronous>, transform_indices = @transform_1, window_bounds = array<i64: 128, 128>}, {pipeline_mode = #tpu.pipeline_mode<synchronous>, transform_indices = @transform_2, window_bounds = array<i64: 1, 128>}, {transform_indices = @transform_3, window_bounds = array<i64: 8, 128>}]} {
    %c0 = arith.constant 0 : index
    %c0_0 = arith.constant 0 : index
    %0 = vector.load %arg1[%c0, %c0_0] : memref<8x128xf32, #tpu.memory_space<vmem>>, vector<8x128xf32>
    %c0_1 = arith.constant 0 : index
    %c0_2 = arith.constant 0 : index
    %1 = vector.load %arg2[%c0_1, %c0_2] : memref<128x128xf32, #tpu.memory_space<vmem>>, vector<128x128xf32>
    %cst = arith.constant dense<0.000000e+00> : vector<8x128xf32>
    %2 = tpu.matmul %0, %1, %cst {dimension_numbers = #tpu.dot_dimension_numbers<[1], [0], [0], [1], [0, 0, 1, 1], [], []>} : vector<8x128xf32>, vector<128x128xf32>, vector<8x128xf32> -> vector<8x128xf32>
    %c0_3 = arith.constant 0 : index
    %c0_4 = arith.constant 0 : index
    %3 = vector.load %arg3[%c0_3, %c0_4] : memref<1x128xf32, #tpu.memory_space<vmem>>, vector<1x128xf32>
    %4 = vector.broadcast %3 : vector<1x128xf32> to vector<8x128xf32>
    %5 = arith.addf %2, %4 : vector<8x128xf32>
    %c0_5 = arith.constant 0 : index
    %c0_6 = arith.constant 0 : index
    %6 = vector.load %arg4[%c0_5, %c0_6] : memref<8x128xf32, #tpu.memory_space<vmem>>, vector<8x128xf32>
    tpu.vector_store %arg4[%c0_5, %c0_6], %5 {strides = array<i32>} : memref<8x128xf32, #tpu.memory_space<vmem>>, vector<8x128xf32>,
    return
  }
  func.func @transform_0(%arg0: i32) -> (i32, i32) {
    %c0_i32 = arith.constant 0 : i32
    %c0_i32_0 = arith.constant 0 : i32
    return %arg0, %c0_i32 : i32, i32
  }
  func.func @transform_1(%arg0: i32) -> (i32, i32) {
    %c0_i32 = arith.constant 0 : i32
    %c0_i32_0 = arith.constant 0 : i32
    %c0_i32_1 = arith.constant 0 : i32
    return %c0_i32, %c0_i32_0 : i32, i32
  }
  func.func @transform_2(%arg0: i32) -> (i32, i32) {
    %c0_i32 = arith.constant 0 : i32
    %c0_i32_0 = arith.constant 0 : i32
    %c0_i32_1 = arith.constant 0 : i32
    return %c0_i32, %c0_i32_0 : i32, i32
  }
  func.func @transform_3(%arg0: i32) -> (i32, i32) {
    %c0_i32 = arith.constant 0 : i32
    %c0_i32_0 = arith.constant 0 : i32
    return %arg0, %c0_i32 : i32, i32
  }
}

</mosaic_0001>

<bundles_post_ra>
// kernel: classifier_forward.1
= control target key start
LH: loop header
LB: loop body
LE: loop exit
PB: predicated region body
PF: predicated region fallthrough
CT: control target
= control target key end

     0   :  { %v229_v3 = vmov 0.0|0.0   ;;  %vm230_vm0 = vmmov 0   ;;  %v231_v6 = vmov 0.0   ;;  %s319_s0 = inlined_call_operand.vmem [shape: f32[8,128], index: 0, kind: input, shape index: {}]   ;;  %s320_s1 = inlined_call_operand.vmem [shape: f32[128,128], index: 1, kind: input, shape index: {}]   ;;  %s321_s2 = inlined_call_operand.vmem [shape: f32[1,128], index: 2, kind: input, shape index: {}]   ;;  %s322_s3 = inlined_call_operand.hbm [shape: f32[8,128], index: 3, kind: output, shape index: {}]  }
   0x1   :  { %v16_v0 = vld [vmem:[%s320_s1] sm:$0xff]  ;;  %v17_v1 = vld [vmem:[%s320_s1 + $0x8] sm:$0xff]  ;;  %v18_v2 = vld [vmem:[%s320_s1 + $0x10] sm:$0xff]  ;;  %177 = vmatprep.subr.bf16.mxu0 %v229_v3  ;;  %174 = vmatprep.mubr.msk.f32.mxu0 %vm230_vm0, %v231_v6 }
   0x2   :  { %v178_v4 = vpack.c.bf16 %v17_v1, %v16_v0  ;;  %v19_v5 = vld [vmem:[%s320_s1 + $0x18] sm:$0xff]  ;;  %v20_v8 = vld [vmem:[%s320_s1 + $0x20] sm:$0xff]  ;;  %v21_v9 = vld [vmem:[%s320_s1 + $0x28] sm:$0xff] }
   0x3   :  { %v181_v7 = vpack.c.bf16 %v19_v5, %v18_v2 }
   0x4   :  { %179 = vmatpush3.bf16.msra.mxu0 %v178_v4 }
   0x5   :  { %180 = vmatprep.subr.bf16.mxu0 %v229_v3 }
   0x6   :  { %8 = vsyncpa [#allocation3], 0  ;;  %v184_v10 = vpack.c.bf16 %v21_v9, %v20_v8  ;;  %v22_v11 = vld [vmem:[%s320_s1 + $0x30] sm:$0xff]  ;;  %v23_v12 = vld [vmem:[%s320_s1 + $0x38] sm:$0xff]  ;;  %s232_s21 = smov [#allocation2]  }
   0x7   :  { %v187_v13 = vpack.c.bf16 %v23_v12, %v22_v11  ;;  %v24_v14 = vld [vmem:[%s320_s1 + $0x40] sm:$0xff]  ;;  %v25_v15 = vld [vmem:[%s320_s1 + $0x48] sm:$0xff]  ;;  %v26_v17 = vld [vmem:[%s320_s1 + $0x50] sm:$0xff]  ;;  %s116_s22 = sshll.u32 %s232_s21, 4  ;;  %s117_s22 = int_to_ptr.vmem [resolvable:$true] %s116_s22 }
   0x8   :  { %182 = vmatpush3.bf16.msra.mxu0 %v181_v7  ;;  %v190_v16 = vpack.c.bf16 %v25_v15, %v24_v14  ;;  %v27_v18 = vld [vmem:[%s320_s1 + $0x58] sm:$0xff]  ;;  %v28_v20 = vld [vmem:[%s320_s1 + $0x60] sm:$0xff]  ;;  %v29_v21 = vld [vmem:[%s320_s1 + $0x68] sm:$0xff]  ;;  %p210_p1 = scmp.lt.s32.totalorder %s117_s22, %s117_s22 }
   0x9   :  { %183 = vmatprep.subr.bf16.mxu0 %v229_v3  ;;  %v193_v19 = vpack.c.bf16 %v27_v18, %v26_v17  ;;  %v196_v22 = vpack.c.bf16 %v29_v21, %v28_v20  ;;  %v30_v23 = vld [vmem:[%s320_s1 + $0x70] sm:$0xff]  ;;  %v31_v24 = vld [vmem:[%s320_s1 + $0x78] sm:$0xff]  ;;  %v15_v26 = vld [vmem:[%s319_s0] sm:$0xff]  ;;  %s205_s1 = scalar_lea.vmem %s117_s22, 128 }
   0xa   :  { %v199_v25 = vpack.c.bf16 %v31_v24, %v30_v23  ;;  %v124_v27 = vld [vmem:[%s321_s2] ss:$0 sm:$0xff]  ;;  %p206_p0 = scmp.ne.s32.totalorder %s117_s22, %s205_s1  ;;  %p211_p2 = scmp.lt.s32.totalorder %s205_s1, %s205_s1 }
   0xc   :  { %185 = vmatpush3.bf16.msra.mxu0 %v184_v10  ;;  %p212_p3 = por %p211_p2, %p210_p1 }
   0xd   :  { %186 = vmatprep.subr.bf16.mxu0 %v229_v3 }
   0xe   :  { %p213_p4 = pnand %p212_p3, %p206_p0 }
  0x10   :  { %188 = vmatpush3.bf16.msra.mxu0 %v187_v13 }
  0x11   :  { %189 = vmatprep.subr.bf16.mxu0 %v229_v3 }
  0x14   :  { %191 = vmatpush3.bf16.msra.mxu0 %v190_v16 }
  0x15   :  { %192 = vmatprep.subr.bf16.mxu0 %v229_v3 }
  0x18   :  { %194 = vmatpush3.bf16.msra.mxu0 %v193_v19 }
  0x19   :  { %195 = vmatprep.subr.bf16.mxu0 %v229_v3 }
  0x1c   :  { %197 = vmatpush3.bf16.msra.mxu0 %v196_v22 }
  0x1d   :  { %198 = vmatprep.subr.bf16.mxu0 %v229_v3 }
  0x20   :  { %200 = vmatpush3.bf16.msra.mxu0 %v199_v25 }
  0x23   :  { %175 = vmatmul.mubr.f32.vlgmr.msra.gmra.mrb[0].mxu0 %v15_v26 }
  0xf6   :  { %v105_v28 = vpop.f32.mrb[0].mxu0 }
  0xf7   :  { %v106_v29 = vadd.f32 %v124_v27, %v105_v28  ;;  %v176_v30 = vpop.f32.mrb[1].mxu0 }
  0xf9   :  { %109 = vst [vmem:[#allocation2] sm:$0xff] %v106_v29 }
  0xfa   :  { %216 = shalt.err (!%p213_p4)
}
  0xfb   :  { %s217_s24 = scalar_lea.hbm %s322_s3, 128 }
  0xfc   :  { %p218_p5 = scmp.ne.s32.totalorder %s322_s3, %s217_s24  ;;  %p221_p6 = scmp.lt.u32.totalorder %s217_s24, %s322_s3 }
  0xfe   :  { %p223_p7 = pnand %p221_p6, %p218_p5 }
 0x100   :  { %226 = shalt.err (!%p223_p7)
}
 0x101   :  { %119 = dma.vmem_to_hbm [thread:$0]  %s117_s22, 128, %s322_s3, [#allocation3]  }
 0x102   :  { %227 = dma.done.wait [#allocation3], 128  }
 0x103   :  { %228 = vsyncadd [#allocation3], 4294967168 }
 0x104   :  { %123 = vsyncpa [#allocation3], 1 }

</bundles_post_ra>
